<compile_context>
chip_gen: v7x
topology: tpu7x:2x2x1
jax: 0.10.0
libtpu: 0.0.40
codegen_flags: <defaults>
</compile_context>

<pallas_src>
import functools

import jax
import jax.numpy as jnp
from jax.experimental import pallas as pl
from jax.experimental.pallas import tpu as pltpu

_EPS = 1e-5


def _round_up(n: int, m: int) -> int:
    return ((n + m - 1) // m) * m


def _vmem_budget_bytes() -> int:
    cap = 64 * 1024 * 1024  # conservative default (v7x per-TC VMEM)
    try:
        info = pltpu.get_tpu_info()
        cap = int(getattr(info, "vmem_capacity_bytes", cap))
    except Exception:
        pass
    return (cap * 3) // 4


# --------------------------------------------------------------------------
# Single-tile fused kernel: whole batch fits one tile.  Linear -> [BN] ->
# ReLU -> Linear in one pass (exact two-pass variance).
# --------------------------------------------------------------------------
def _fused_kernel(x_ref, w1_ref, b1_ref, g_ref, bt_ref, w2_ref, b2_ref, o_ref,
                  *, apply_bn: bool, batch: int, eps: float):
    h = jnp.dot(x_ref[...].astype(w1_ref.dtype), w1_ref[...],
                preferred_element_type=jnp.float32) + b1_ref[...]
    if apply_bn:
        inv_b = jnp.float32(1.0 / batch)
        mean = jnp.sum(h, axis=0, keepdims=True) * inv_b
        hc = h - mean
        var = jnp.sum(hc * hc, axis=0, keepdims=True) * inv_b
        h = hc * (g_ref[...] * jax.lax.rsqrt(var + eps)) + bt_ref[...]
    h = jnp.maximum(h, 0.0)  # ReLU; dropout is identity in eval mode
    o_ref[...] = (jnp.dot(h.astype(w2_ref.dtype), w2_ref[...],
                          preferred_element_type=jnp.float32) + b2_ref[...])


# --------------------------------------------------------------------------
# Two-phase kernel for a tiled batch (B > tile_b, BN always applies):
#   phase 0: accumulate global sum / sum-of-squares of h = x@W1 + b1
#            (rows past the true batch are masked), optionally cache h.
#   phase 1: derive scale/shift once, normalize + ReLU + second matmul.
# --------------------------------------------------------------------------
def _two_phase_kernel(x_ref, w1_ref, b1_ref, g_ref, bt_ref, w2_ref, b2_ref,
                      o_ref, *scratch, batch: int, eps: float, tile_b: int,
                      cache_h: bool):
    if cache_h:
        hcache_ref, sum_ref, ssq_ref, scale_ref, shift_ref = scratch
    else:
        sum_ref, ssq_ref, scale_ref, shift_ref = scratch
        hcache_ref = None

    phase = pl.program_id(0)
    tile = pl.program_id(1)
    row0 = pl.multiple_of(tile * tile_b, tile_b)

    @pl.when(phase == 0)
    def _():
        @pl.when(tile == 0)
        def _():
            sum_ref[...] = jnp.zeros_like(sum_ref)
            ssq_ref[...] = jnp.zeros_like(ssq_ref)

        h = jnp.dot(x_ref[...].astype(w1_ref.dtype), w1_ref[...],
                    preferred_element_type=jnp.float32) + b1_ref[...]
        # Mask rows beyond the true batch (ragged last tile reads garbage).
        row = jax.lax.broadcasted_iota(jnp.int32, h.shape, 0) + tile * tile_b
        hm = jnp.where(row < batch, h, 0.0)
        # NOTE: var = E[h^2] - mean^2 in f32; h-cache enables an exact
        # two-pass variance if tighter accuracy is ever required.
        sum_ref[...] += jnp.sum(hm, axis=0, keepdims=True)
        ssq_ref[...] += jnp.sum(hm * hm, axis=0, keepdims=True)
        if cache_h:
            hcache_ref[pl.ds(row0, tile_b), :] = h.astype(hcache_ref.dtype)

    @pl.when(phase == 1)
    def _():
        @pl.when(tile == 0)
        def _():
            inv_b = jnp.float32(1.0 / batch)
            mean = sum_ref[...] * inv_b
            var = jnp.maximum(ssq_ref[...] * inv_b - mean * mean, 0.0)
            scale = g_ref[...] * jax.lax.rsqrt(var + eps)
            scale_ref[...] = scale
            shift_ref[...] = bt_ref[...] - mean * scale

        if cache_h:
            h = hcache_ref[pl.ds(row0, tile_b), :].astype(jnp.float32)
        else:
            h = jnp.dot(x_ref[...].astype(w1_ref.dtype), w1_ref[...],
                        preferred_element_type=jnp.float32) + b1_ref[...]
        h = jnp.maximum(h * scale_ref[...] + shift_ref[...], 0.0)
        o_ref[...] = (jnp.dot(h.astype(w2_ref.dtype), w2_ref[...],
                              preferred_element_type=jnp.float32) + b2_ref[...])


def multiclass_classification_forward(x, params, *, use_bf16: bool = False,
                                      tile_b: int = 1024, cache_h=None):
    """x: (B, num_feature).  params: dict from init_params."""
    B, F = x.shape
    H = params["w1"].shape[1]
    C = params["w2"].shape[1]
    apply_bn = B > 1  # static, mirrors the PyTorch `if x.shape[0] > 1`

    H_pad = _round_up(H, 128)
    f32 = jnp.float32
    mm_dtype = jnp.bfloat16 if use_bf16 else f32

    # Weights / bias / BN vectors: padded + cast once (tiny, one-off).
    # x itself is NOT padded or cast in the wrapper.
    w1 = jnp.pad(params["w1"].astype(f32), ((0, 0), (0, H_pad - H))).astype(mm_dtype)
    b1 = jnp.pad(params["b1"].astype(f32), ((0, 0), (0, H_pad - H)))
    gamma = jnp.pad(params["gamma"].astype(f32), ((0, 0), (0, H_pad - H)),
                    constant_values=1.0)
    beta = jnp.pad(params["beta"].astype(f32), ((0, 0), (0, H_pad - H)))
    w2 = jnp.pad(params["w2"].astype(f32), ((0, H_pad - H), (0, 0))).astype(mm_dtype)
    b2 = params["b2"].astype(f32)

    x_isz = jnp.dtype(x.dtype).itemsize
    w_isz = jnp.dtype(mm_dtype).itemsize
    budget = _vmem_budget_bytes()
    weights_bytes = 2 * (F * H_pad + H_pad * C) * w_isz + 5 * H_pad * 4 + C * 4

    if (not apply_bn) or B <= tile_b:
        # ---- Single fused tile ----
        kernel = functools.partial(_fused_kernel, apply_bn=apply_bn, batch=B,
                                   eps=_EPS)
        const1 = lambda i: (0, 0)
        grid_spec = pltpu.PrefetchScalarGridSpec(
            num_scalar_prefetch=0,
            grid=(1,),
            in_specs=[
                pl.BlockSpec((B, F), const1),        # x
                pl.BlockSpec((F, H_pad), const1),    # w1
                pl.BlockSpec((1, H_pad), const1),    # b1
                pl.BlockSpec((1, H_pad), const1),    # gamma
                pl.BlockSpec((1, H_pad), const1),    # beta
                pl.BlockSpec((H_pad, C), const1),    # w2
                pl.BlockSpec((1, C), const1),        # b2
            ],
            out_specs=pl.BlockSpec((B, C), const1),
        )
        dims = ("arbitrary",)
        flops = 2 * B * F * H_pad + 2 * B * H_pad * C
        bytes_accessed = B * F * x_isz + (F * H_pad + H_pad * C) * w_isz + B * C * 4
        vmem_needed = (2 * B * F * x_isz + 2 * B * C * 4 + B * H_pad * 4
                       + weights_bytes + (1 << 20))
    else:
        # ---- Tiled batch, two-phase BN with VMEM h-cache ----
        nbt = pl.cdiv(B, tile_b)
        TB = _round_up(pl.cdiv(B, nbt), 8)   # balanced tiles -> minimal overshoot
        nbt = pl.cdiv(B, TB)
        cache_dtype = jnp.bfloat16 if use_bf16 else jnp.float32
        cache_bytes = nbt * TB * H_pad * jnp.dtype(cache_dtype).itemsize
        fixed_bytes = (2 * (TB * F * x_isz + TB * C * 4) + weights_bytes
                       + 4 * H_pad * 4 + (1 << 20))
        if cache_h is None:
            cache_h = (cache_bytes + fixed_bytes) <= budget

        kernel = functools.partial(_two_phase_kernel, batch=B, eps=_EPS,
                                   tile_b=TB, cache_h=cache_h)
        # With the h-cache, x is only streamed during phase 0; in phase 1 the
        # x block index collapses to 0 so no further x DMAs are issued.
        x_map = (lambda p, i: (i * (1 - p), 0)) if cache_h else (lambda p, i: (i, 0))
        const2 = lambda p, i: (0, 0)

        scratch = []
        if cache_h:
            scratch.append(pltpu.VMEM((nbt * TB, H_pad), cache_dtype))
        scratch += [pltpu.VMEM((1, H_pad), jnp.float32) for _ in range(4)]

        grid_spec = pltpu.PrefetchScalarGridSpec(
            num_scalar_prefetch=0,
            grid=(2, nbt),
            in_specs=[
                pl.BlockSpec((TB, F), x_map),        # x (batch-tiled)
                pl.BlockSpec((F, H_pad), const2),    # w1 (resident)
                pl.BlockSpec((1, H_pad), const2),    # b1
                pl.BlockSpec((1, H_pad), const2),    # gamma
                pl.BlockSpec((1, H_pad), const2),    # beta
                pl.BlockSpec((H_pad, C), const2),    # w2
                pl.BlockSpec((1, C), const2),        # b2
            ],
            # Output block pinned at 0 (never written, never flushed) during
            # phase 0, then tracks the batch tile in phase 1.
            out_specs=pl.BlockSpec((TB, C), lambda p, i: (p * i, 0)),
            scratch_shapes=scratch,
        )
        # Batch axis carries BN state -> must stay "arbitrary".
        dims = ("arbitrary", "arbitrary")
        n_pass = 1 if cache_h else 2
        flops = 2 * B * F * H_pad * n_pass + 2 * B * H_pad * C
        bytes_accessed = (B * F * x_isz * n_pass
                          + (F * H_pad + H_pad * C) * w_isz + B * C * 4)
        vmem_needed = (cache_bytes if cache_h else 0) + fixed_bytes

    vmem_limit = int(min(budget, max(2 * vmem_needed, 16 << 20)))
    cost = pl.CostEstimate(flops=int(flops), transcendentals=0,
                           bytes_accessed=int(bytes_accessed))

    out = pl.pallas_call(
        kernel,
        out_shape=jax.ShapeDtypeStruct((B, C), jnp.float32),
        grid_spec=grid_spec,
        compiler_params=pltpu.CompilerParams(
            dimension_semantics=dims,
            vmem_limit_bytes=vmem_limit),
        cost_estimate=cost,
    )(x, w1, b1, gamma, beta, w2, b2)
    return out


def init_params(key, num_feature, num_class, hidden=64):
    """PyTorch-style init: U(-1/sqrt(fan_in), 1/sqrt(fan_in))."""
    k1, k2, k3, k4 = jax.random.split(key, 4)
    bound1 = 1.0 / jnp.sqrt(jnp.float32(num_feature))
    bound2 = 1.0 / jnp.sqrt(jnp.float32(hidden))
    return {
        # stored as (in, out) so the kernel does x @ W (== PyTorch x @ W.T)
        "w1": jax.random.uniform(k1, (num_feature, hidden), jnp.float32,
                                 -bound1, bound1),
        "b1": jax.random.uniform(k2, (1, hidden), jnp.float32, -bound1, bound1),
        "gamma": jnp.ones((1, hidden), jnp.float32),
        "beta": jnp.zeros((1, hidden), jnp.float32),
        "w2": jax.random.uniform(k3, (hidden, num_class), jnp.float32,
                                 -bound2, bound2),
        "b2": jax.random.uniform(k4, (1, num_class), jnp.float32,
                                 -bound2, bound2),
    }


def reference_forward(x, params, eps=_EPS):
    """Pure-JAX reference mirroring the PyTorch forward (training-mode BN)."""
    h = x @ params["w1"] + params["b1"]
    if x.shape[0] > 1:
        mean = h.mean(axis=0, keepdims=True)
        var = ((h - mean) ** 2).mean(axis=0, keepdims=True)
        h = (h - mean) / jnp.sqrt(var + eps) * params["gamma"] + params["beta"]
    h = jnp.maximum(h, 0.0)
    return h @ params["w2"] + params["b2"]


if __name__ == "__main__":
    NUM_FEATURE = 32
    NUM_CLASS = 8

    key = jax.random.PRNGKey(0)
    kx, kp = jax.random.split(key)
    params = init_params(kp, NUM_FEATURE, NUM_CLASS)

    # 1) Batched path, batch fits one tile: fused Linear->BN->ReLU->Linear.
    x = jax.random.normal(kx, (16, NUM_FEATURE), jnp.float32)
    out = jax.block_until_ready(multiclass_classification_forward(x, params))
    ref = reference_forward(x, params)
    assert out.shape == (16, NUM_CLASS)
    assert jnp.all(jnp.isfinite(out))
    assert jnp.allclose(out, ref, atol=1e-4, rtol=1e-4), \
        float(jnp.max(jnp.abs(out - ref)))

    # 2) batch == 1 path (BatchNorm skipped, matching `if x.shape[0] > 1`).
    out1 = jax.block_until_ready(
        multiclass_classification_forward(x[:1], params))
    ref1 = reference_forward(x[:1], params)
    assert out1.shape == (1, NUM_CLASS)
    assert jnp.allclose(out1, ref1, atol=1e-4, rtol=1e-4), \
        float(jnp.max(jnp.abs(out1 - ref1)))

    # 3) Tiled two-phase BN path (ragged last tile) with the VMEM h-cache.
    xb = jax.random.normal(kx, (20, NUM_FEATURE), jnp.float32)
    out2 = jax.block_until_ready(
        multiclass_classification_forward(xb, params, tile_b=8))
    ref2 = reference_forward(xb, params)
    assert out2.shape == (20, NUM_CLASS)
    assert jnp.allclose(out2, ref2, atol=1e-4, rtol=1e-4), \
        float(jnp.max(jnp.abs(out2 - ref2)))

    # 4) Same tiled path with the h-cache disabled (recompute fallback).
    out3 = jax.block_until_ready(
        multiclass_classification_forward(xb, params, tile_b=8, cache_h=False))
    assert jnp.allclose(out3, ref2, atol=1e-4, rtol=1e-4), \
        float(jnp.max(jnp.abs(out3 - ref2)))

    print("KERNEL_OK")
</pallas_src>

<mosaic_0001>
module attributes {stable_mosaic.version = 11 : i64} {
  func.func @_fused_kernel(%arg0: i32, %arg1: memref<16x32xf32, #tpu.memory_space<vmem>>, %arg2: memref<32x128xf32, #tpu.memory_space<vmem>>, %arg3: memref<1x128xf32, #tpu.memory_space<vmem>>, %arg4: memref<1x128xf32, #tpu.memory_space<vmem>>, %arg5: memref<1x128xf32, #tpu.memory_space<vmem>>, %arg6: memref<128x8xf32, #tpu.memory_space<vmem>>, %arg7: memref<1x8xf32, #tpu.memory_space<vmem>>, %arg8: memref<16x8xf32, #tpu.memory_space<vmem>>) attributes {dimension_semantics = [#tpu.dimension_semantics<arbitrary>], iteration_bounds = array<i64: 1>, scalar_prefetch = 0 : i64, scratch_operands = 0 : i64, tpu.core_type = #tpu.core_type<tc>, window_params = [{pipeline_mode = #tpu.pipeline_mode<synchronous>, transform_indices = @transform_0, window_bounds = array<i64: 16, 32>}, {pipeline_mode = #tpu.pipeline_mode<synchronous>, transform_indices = @transform_1, window_bounds = array<i64: 32, 128>}, {pipeline_mode = #tpu.pipeline_mode<synchronous>, transform_indices = @transform_2, window_bounds = array<i64: 1, 128>}, {pipeline_mode = #tpu.pipeline_mode<synchronous>, transform_indices = @transform_3, window_bounds = array<i64: 1, 128>}, {pipeline_mode = #tpu.pipeline_mode<synchronous>, transform_indices = @transform_4, window_bounds = array<i64: 1, 128>}, {pipeline_mode = #tpu.pipeline_mode<synchronous>, transform_indices = @transform_5, window_bounds = array<i64: 128, 8>}, {pipeline_mode = #tpu.pipeline_mode<synchronous>, transform_indices = @transform_6, window_bounds = array<i64: 1, 8>}, {pipeline_mode = #tpu.pipeline_mode<synchronous>, transform_indices = @transform_7, window_bounds = array<i64: 16, 8>}]} {
    %c0 = arith.constant 0 : index
    %c0_0 = arith.constant 0 : index
    %0 = vector.load %arg1[%c0, %c0_0] : memref<16x32xf32, #tpu.memory_space<vmem>>, vector<16x32xf32>
    %c0_1 = arith.constant 0 : index
    %c0_2 = arith.constant 0 : index
    %1 = vector.load %arg2[%c0_1, %c0_2] : memref<32x128xf32, #tpu.memory_space<vmem>>, vector<32x128xf32>
    %cst = arith.constant dense<0.000000e+00> : vector<16x128xf32>
    %2 = tpu.matmul %0, %1, %cst {dimension_numbers = #tpu.dot_dimension_numbers<[1], [0], [0], [1], [0, 0, 1, 1], [], []>} : vector<16x32xf32>, vector<32x128xf32>, vector<16x128xf32> -> vector<16x128xf32>
    %c0_3 = arith.constant 0 : index
    %c0_4 = arith.constant 0 : index
    %3 = vector.load %arg3[%c0_3, %c0_4] : memref<1x128xf32, #tpu.memory_space<vmem>>, vector<1x128xf32>
    %4 = vector.broadcast %3 : vector<1x128xf32> to vector<16x128xf32>
    %5 = arith.addf %2, %4 : vector<16x128xf32>
    %cst_5 = arith.constant dense<0.000000e+00> : vector<128xf32>
    %6 = vector.multi_reduction <add>, %5, %cst_5 [0] : vector<16x128xf32> to vector<128xf32>
    %7 = vector.shape_cast %6 : vector<128xf32> to vector<1x128xf32>
    %cst_6 = arith.constant 6.250000e-02 : f32
    %8 = vector.broadcast %cst_6 : f32 to vector<1x128xf32>
    %9 = arith.mulf %7, %8 : vector<1x128xf32>
    %10 = vector.broadcast %9 : vector<1x128xf32> to vector<16x128xf32>
    %11 = arith.subf %5, %10 : vector<16x128xf32>
    %12 = arith.mulf %11, %11 : vector<16x128xf32>
    %cst_7 = arith.constant dense<0.000000e+00> : vector<128xf32>
    %13 = vector.multi_reduction <add>, %12, %cst_7 [0] : vector<16x128xf32> to vector<128xf32>
    %14 = vector.shape_cast %13 : vector<128xf32> to vector<1x128xf32>
    %cst_8 = arith.constant 6.250000e-02 : f32
    %15 = vector.broadcast %cst_8 : f32 to vector<1x128xf32>
    %16 = arith.mulf %14, %15 : vector<1x128xf32>
    %c0_9 = arith.constant 0 : index
    %c0_10 = arith.constant 0 : index
    %17 = vector.load %arg4[%c0_9, %c0_10] : memref<1x128xf32, #tpu.memory_space<vmem>>, vector<1x128xf32>
    %cst_11 = arith.constant 9.99999974E-6 : f32
    %18 = vector.broadcast %cst_11 : f32 to vector<1x128xf32>
    %19 = arith.addf %16, %18 : vector<1x128xf32>
    %20 = math.rsqrt %19 : vector<1x128xf32>
    %21 = arith.mulf %17, %20 : vector<1x128xf32>
    %22 = vector.broadcast %21 : vector<1x128xf32> to vector<16x128xf32>
    %23 = arith.mulf %11, %22 : vector<16x128xf32>
    %c0_12 = arith.constant 0 : index
    %c0_13 = arith.constant 0 : index
    %24 = vector.load %arg5[%c0_12, %c0_13] : memref<1x128xf32, #tpu.memory_space<vmem>>, vector<1x128xf32>
    %25 = vector.broadcast %24 : vector<1x128xf32> to vector<16x128xf32>
    %26 = arith.addf %23, %25 : vector<16x128xf32>
    %cst_14 = arith.constant 0.000000e+00 : f32
    %27 = vector.broadcast %cst_14 : f32 to vector<16x128xf32>
    %28 = arith.maximumf %26, %27 : vector<16x128xf32>
    %c0_15 = arith.constant 0 : index
    %c0_16 = arith.constant 0 : index
    %29 = vector.load %arg6[%c0_15, %c0_16] : memref<128x8xf32, #tpu.memory_space<vmem>>, vector<128x8xf32>
    %cst_17 = arith.constant dense<0.000000e+00> : vector<16x8xf32>
    %30 = tpu.matmul %28, %29, %cst_17 {dimension_numbers = #tpu.dot_dimension_numbers<[1], [0], [0], [1], [0, 0, 1, 1], [], []>} : vector<16x128xf32>, vector<128x8xf32>, vector<16x8xf32> -> vector<16x8xf32>
    %c0_18 = arith.constant 0 : index
    %c0_19 = arith.constant 0 : index
    %31 = vector.load %arg7[%c0_18, %c0_19] : memref<1x8xf32, #tpu.memory_space<vmem>>, vector<1x8xf32>
    %32 = vector.broadcast %31 : vector<1x8xf32> to vector<16x8xf32>
    %33 = arith.addf %30, %32 : vector<16x8xf32>
    %c0_20 = arith.constant 0 : index
    %c0_21 = arith.constant 0 : index
    %34 = vector.load %arg8[%c0_20, %c0_21] : memref<16x8xf32, #tpu.memory_space<vmem>>, vector<16x8xf32>
    tpu.vector_store %arg8[%c0_20, %c0_21], %33 {strides = array<i32>} : memref<16x8xf32, #tpu.memory_space<vmem>>, vector<16x8xf32>,
    return
  }
  func.func @transform_0(%arg0: i32) -> (i32, i32) {
    %c0_i32 = arith.constant 0 : i32
    %c0_i32_0 = arith.constant 0 : i32
    %c0_i32_1 = arith.constant 0 : i32
    return %c0_i32, %c0_i32_0 : i32, i32
  }
  func.func @transform_1(%arg0: i32) -> (i32, i32) {
    %c0_i32 = arith.constant 0 : i32
    %c0_i32_0 = arith.constant 0 : i32
    %c0_i32_1 = arith.constant 0 : i32
    return %c0_i32, %c0_i32_0 : i32, i32
  }
  func.func @transform_2(%arg0: i32) -> (i32, i32) {
    %c0_i32 = arith.constant 0 : i32
    %c0_i32_0 = arith.constant 0 : i32
    %c0_i32_1 = arith.constant 0 : i32
    return %c0_i32, %c0_i32_0 : i32, i32
  }
  func.func @transform_3(%arg0: i32) -> (i32, i32) {
    %c0_i32 = arith.constant 0 : i32
    %c0_i32_0 = arith.constant 0 : i32
    %c0_i32_1 = arith.constant 0 : i32
    return %c0_i32, %c0_i32_0 : i32, i32
  }
  func.func @transform_4(%arg0: i32) -> (i32, i32) {
    %c0_i32 = arith.constant 0 : i32
    %c0_i32_0 = arith.constant 0 : i32
    %c0_i32_1 = arith.constant 0 : i32
    return %c0_i32, %c0_i32_0 : i32, i32
  }
  func.func @transform_5(%arg0: i32) -> (i32, i32) {
    %c0_i32 = arith.constant 0 : i32
    %c0_i32_0 = arith.constant 0 : i32
    %c0_i32_1 = arith.constant 0 : i32
    return %c0_i32, %c0_i32_0 : i32, i32
  }
  func.func @transform_6(%arg0: i32) -> (i32, i32) {
    %c0_i32 = arith.constant 0 : i32
    %c0_i32_0 = arith.constant 0 : i32
    %c0_i32_1 = arith.constant 0 : i32
    return %c0_i32, %c0_i32_0 : i32, i32
  }
  func.func @transform_7(%arg0: i32) -> (i32, i32) {
    %c0_i32 = arith.constant 0 : i32
    %c0_i32_0 = arith.constant 0 : i32
    %c0_i32_1 = arith.constant 0 : i32
    return %c0_i32, %c0_i32_0 : i32, i32
  }
}

</mosaic_0001>

<bundles_post_ra>
// kernel: tpu_custom_call.1
= control target key start
LH: loop header
LB: loop body
LE: loop exit
PB: predicated region body
PF: predicated region fallthrough
CT: control target
= control target key end

     0   :  { %vm39_vm0 = vcmask 261120   ;;  %v146_v58 = vlaneseq  ;;  %vm262_vm1 = vcmask 64512   ;;  %s510_s1 = inlined_call_operand.vmem [shape: f32[32,128], index: 1, kind: input, shape index: {}]   ;;  %s511_s0 = inlined_call_operand.vmem [shape: f32[16,32], index: 0, kind: input, shape index: {}]   ;;  %s512_s5 = inlined_call_operand.vmem [shape: f32[128,8], index: 5, kind: input, shape index: {}]   ;;  %s513_s2 = inlined_call_operand.vmem [shape: f32[1,128], index: 2, kind: input, shape index: {}]   ;;  %s514_s3 = inlined_call_operand.vmem [shape: f32[1,128], index: 3, kind: input, shape index: {}]   ;;  %s515_s4 = inlined_call_operand.vmem [shape: f32[1,128], index: 4, kind: input, shape index: {}]   ;;  %s516_s6 = inlined_call_operand.vmem [shape: f32[1,8], index: 6, kind: input, shape index: {}]   ;;  %s517_s7 = inlined_call_operand.vmem [shape: f32[16,8], index: 7, kind: output, shape index: {}]  }
   0x1   :  { %v28_v0 = vld [vmem:[%s510_s1] sm:$0xff]  ;;  %v29_v1 = vld [vmem:[%s510_s1 + $0x8] sm:$0xff]  ;;  %v30_v2 = vld [vmem:[%s510_s1 + $0x10] sm:$0xff] }
   0x2   :  { %v344_v3 = vpack.c.bf16 %v29_v1, %v28_v0  ;;  %v31_v4 = vld [vmem:[%s510_s1 + $0x18] sm:$0xff]  ;;  %v26_v5 = vld [vmem:[%s511_s0] sm:$0xff]  ;;  %v27_v7 = vld [vmem:[%s511_s0 + $0x8] sm:$0xff]  ;;  %v147_v59 = vshrl.u32 %v146_v58, 7 }
   0x3   :  { %v348_v6 = vpack.c.bf16 %v31_v4, %v30_v2  ;;  %306 = vmatprep.mubr.msk.f32.mxu0 %vm39_vm0, %v26_v5  ;;  %v164_v8 = vld [vmem:[%s512_s5] sm:$0xff]  ;;  %v165_v9 = vld [vmem:[%s512_s5 + $0x8] sm:$0xff]  ;;  %v166_v11 = vld [vmem:[%s512_s5 + $0x10] sm:$0xff] }
   0x4   :  { %345 = vmatprep.subr.bf16.mxu0 %v344_v3  ;;  %v352_v10 = vpack.c.bf16 %v165_v9, %v164_v8  ;;  %v167_v12 = vld [vmem:[%s512_s5 + $0x18] sm:$0xff]  ;;  %v168_v14 = vld [vmem:[%s512_s5 + $0x20] sm:$0xff]  ;;  %v169_v15 = vld [vmem:[%s512_s5 + $0x28] sm:$0xff]  ;;  %v148_v61 = vsub.s32 0, %v147_v59 }
   0x5   :  { %347 = vmatpush3.bf16.msra.mxu0 %v344_v3  ;;  %v356_v13 = vpack.c.bf16 %v167_v12, %v166_v11  ;;  %v360_v16 = vpack.c.bf16 %v169_v15, %v168_v14  ;;  %v170_v17 = vld [vmem:[%s512_s5 + $0x30] sm:$0xff]  ;;  %v171_v18 = vld [vmem:[%s512_s5 + $0x38] sm:$0xff]  ;;  %v172_v20 = vld [vmem:[%s512_s5 + $0x40] sm:$0xff] }
   0x6   :  { %349 = vmatprep.subr.bf16.mxu0 %v348_v6  ;;  %353 = vmatprep.subr.bf16.mxu1 %v352_v10  ;;  %v364_v19 = vpack.c.bf16 %v171_v18, %v170_v17  ;;  %v173_v21 = vld [vmem:[%s512_s5 + $0x48] sm:$0xff]  ;;  %v174_v23 = vld [vmem:[%s512_s5 + $0x50] sm:$0xff]  ;;  %v175_v24 = vld [vmem:[%s512_s5 + $0x58] sm:$0xff] }
   0x7   :  { %355 = vmatpush3.bf16.msra.mxu1 %v352_v10  ;;  %v368_v22 = vpack.c.bf16 %v173_v21, %v172_v20  ;;  %v372_v25 = vpack.c.bf16 %v175_v24, %v174_v23  ;;  %v176_v26 = vld [vmem:[%s512_s5 + $0x60] sm:$0xff]  ;;  %v177_v27 = vld [vmem:[%s512_s5 + $0x68] sm:$0xff]  ;;  %v178_v29 = vld [vmem:[%s512_s5 + $0x70] sm:$0xff] }
   0x8   :  { %357 = vmatprep.subr.bf16.mxu1 %v356_v13  ;;  %v376_v28 = vpack.c.bf16 %v177_v27, %v176_v26  ;;  %v179_v30 = vld [vmem:[%s512_s5 + $0x78] sm:$0xff]  ;;  %v269_v32 = vld [vmem:[%s513_s2] ss:$0 sm:$0xff] }
   0x9   :  { %351 = vmatpush3.bf16.msra.mxu0 %v348_v6  ;;  %v380_v31 = vpack.c.bf16 %v179_v30, %v178_v29  ;;  %v141_v60 = vld [vmem:[%s514_s3] sm:$0x1] }
   0xa   :  { %v272_v1 = vld [vmem:[%s515_s4] ss:$0 sm:$0xff] }
   0xb   :  { %359 = vmatpush3.bf16.msra.mxu1 %v356_v13  ;;  %v273_v8 = vld [vmem:[%s516_s6] ss:$0 sm:$0xff] }
   0xc   :  { %307 = vmatmul.mubr.msk.f32.vlgmr.msra.gmra.mrb[0].mxu0 %vm39_vm0, %v27_v7  ;;  %361 = vmatprep.subr.bf16.mxu1 %v360_v16 }
   0xf   :  { %363 = vmatpush3.bf16.msra.mxu1 %v360_v16 }
  0x10   :  { %365 = vmatprep.subr.bf16.mxu1 %v364_v19 }
  0x13   :  { %367 = vmatpush3.bf16.msra.mxu1 %v364_v19 }
  0x14   :  { %369 = vmatprep.subr.bf16.mxu1 %v368_v22 }
  0x17   :  { %371 = vmatpush3.bf16.msra.mxu1 %v368_v22 }
  0x18   :  { %373 = vmatprep.subr.bf16.mxu1 %v372_v25 }
  0x1b   :  { %375 = vmatpush3.bf16.msra.mxu1 %v372_v25 }
  0x1c   :  { %377 = vmatprep.subr.bf16.mxu1 %v376_v28 }
  0x1f   :  { %379 = vmatpush3.bf16.msra.mxu1 %v376_v28 }
  0x20   :  { %381 = vmatprep.subr.bf16.mxu1 %v380_v31 }
  0x23   :  { %383 = vmatpush3.bf16.msra.mxu1 %v380_v31 }
  0xdf   :  { %v308_v33 = vpop.f32.mrb[0].mxu0 }
  0xe0   :  { %v118_v34 = vadd.f32 %v308_v33, %v269_v32  ;;  %v112_v35 = vpop.f32.mrb[1].mxu0 }
  0xe1   :  { %v113_v36 = vadd.f32 %v269_v32, %v112_v35 }
  0xe3   :  { %v121_v37 = vadd.f32 %v118_v34, %v113_v36 }
  0xe5   :  { %v122_v38 = vrot.slane %v121_v37, 4 }
  0xe7   :  { %v123_v39 = vadd.f32 %v122_v38, %v121_v37 }
  0xe9   :  { %v124_v40 = vrot.slane %v123_v39, 2 }
  0xeb   :  { %v125_v41 = vadd.f32 %v124_v40, %v123_v39 }
  0xed   :  { %v126_v42 = vrot.slane %v125_v41, 1 }
  0xef   :  { %v127_v43 = vadd.f32 %v126_v42, %v125_v41 }
  0xf1   :  { %v128_v44 = vmul.f32 0.0625, %v127_v43 }
  0xf3   :  { %v129_v45 = vsub.f32 %v113_v36, %v128_v44  ;;  %v130_v46 = vsub.f32 %v118_v34, %v128_v44 }
  0xf5   :  { %v131_v47 = vmul.f32 %v129_v45, %v129_v45  ;;  %v132_v48 = vmul.f32 %v130_v46, %v130_v46 }
  0xf7   :  { %v133_v49 = vadd.f32 %v132_v48, %v131_v47 }
  0xf9   :  { %v134_v50 = vrot.slane %v133_v49, 4 }
  0xfb   :  { %v135_v51 = vadd.f32 %v134_v50, %v133_v49 }
  0xfd   :  { %v136_v52 = vrot.slane %v135_v51, 2 }
  0xff   :  { %v137_v53 = vadd.f32 %v136_v52, %v135_v51 }
 0x101   :  { %v138_v54 = vrot.slane %v137_v53, 1 }
 0x103   :  { %v139_v55 = vadd.f32 %v138_v54, %v137_v53 }
 0x105   :  { %v140_v56 = vmul.f32 0.0625, %v139_v55 }
 0x107   :  { %v142_v57 = vadd.f32 1e-05, %v140_v56 }
 0x109   :  { %384 = vrsqrt.f32 %v142_v57 }
 0x113   :  { %v385_v62 = vpop.eup %384 }
 0x114   :  { %v144_v63 = vmul.f32 %v385_v62, %v141_v60 }
 0x116   :  { %v149_v0 = vrot.slane %v144_v63, %v148_v61 }
 0x118   :  { %v151_v2 = vmul.f32 %v149_v0, %v129_v45  ;;  %v152_v3 = vmul.f32 %v149_v0, %v130_v46 }
 0x11a   :  { %v160_v4 = vadd.f32 %v272_v1, %v151_v2  ;;  %v161_v5 = vadd.f32 %v272_v1, %v152_v3 }
 0x11c   :  { %v162_v6 = vmax.f32 %v160_v4, 0.0  ;;  %v163_v7 = vmax.f32 %v161_v5, 0.0 }
 0x11e   :  { %341 = vmatprep.mubr.f32.mxu1 %v162_v6 }
 0x11f   :  { %342 = vmatmul.mubr.f32.vlgmr.msra.gmra.mrb[0].mxu1 %v163_v7 }
 0x1f2   :  { %v343_v9 = vpop.f32.mrb[0].mxu1 }
 0x1f3   :  { %v259_v10 = vadd.f32 %v343_v9, %v273_v8  ;;  %v253_v11 = vpop.f32.mrb[1].mxu1 }
 0x1f4   :  { %v254_v12 = vadd.f32 %v273_v8, %v253_v11 }
 0x1f5   :  { %264 = vst.msk [vmem:[%s517_s7 + $0x8] sm:$0xff] %vm262_vm1, %v259_v10 }
 0x1f6   :  { %263 = vst.msk [vmem:[%s517_s7] sm:$0xff] %vm262_vm1, %v254_v12 }

</bundles_post_ra>
